<compile_context>
chip_gen: v6e
topology: v6e:2x2x1
jax: 0.10.0
libtpu: 0.0.40
codegen_flags: <defaults>
</compile_context>

<pallas_src>
import jax
import jax.numpy as jnp
from jax.experimental import pallas as pl
from jax.experimental.pallas import tpu as pltpu


def conv1x1_kernel(w_ref, x_ref, o_ref):
    # w_ref: (tm, C_in) bf16 | x_ref: (C_in, cols) f32 | o_ref: (tm, cols) f32
    x_bf16 = x_ref[...].astype(jnp.bfloat16)  # cheap VPU cast; keeps MXU single-pass bf16
    o_ref[...] = jnp.dot(
        w_ref[...],
        x_bf16,
        preferred_element_type=jnp.float32,
        precision=jax.lax.Precision.DEFAULT,
    ).astype(o_ref.dtype)


def _pick_block_rows(c_out: int) -> int:
    # Prefer 3 (then 2) grid steps so the weight DMA overlaps the MXU, while
    # keeping the bf16 weight block's sublane dim a multiple of 16.
    for cand in (c_out // 3, c_out // 2):
        if cand > 0 and c_out % cand == 0 and cand % 16 == 0:
            return cand
    return c_out  # single-block fallback


def conv2d_1x1(x_nchw, weight_oi):
    """1x1 conv, stride 1, no bias.

    x_nchw:    (N, C_in, H, W)   float32
    weight_oi: (C_out, C_in)     float32 (PyTorch (C_out, C_in, 1, 1) squeezed)
    returns:   (N, C_out, H, W)  float32
    """
    N, C_in, H, W = x_nchw.shape
    C_out = weight_oi.shape[0]
    HW = H * W

    # Constant parameter: cast to bf16 once (constant-folded / pre-cast in a
    # real model).  Halves the weight's HBM traffic.
    w_bf16 = weight_oi.astype(jnp.bfloat16)

    if N == 1:
        # Free contiguous view: single-batch NCHW needs no transpose.
        x_mat = x_nchw.reshape(C_in, HW)
        cols = HW
    else:
        # General-batch fallback (module spec uses N=1): fold batch into the
        # column/lane dim so columns stay lane-dense.
        x_mat = jnp.transpose(x_nchw, (1, 0, 2, 3)).reshape(C_in, N * HW)
        cols = N * HW

    tm = _pick_block_rows(C_out)
    grid = (C_out // tm,)

    cost = pl.CostEstimate(
        flops=2 * C_out * C_in * cols,
        bytes_accessed=C_out * C_in * 2 + C_in * cols * 4 + C_out * cols * 4,
        transcendentals=0,
    )

    out_mat = pl.pallas_call(
        conv1x1_kernel,
        out_shape=jax.ShapeDtypeStruct((C_out, cols), x_nchw.dtype),
        grid=grid,
        in_specs=[
            # Weight tiles stream (double-buffered) along the C_out grid axis.
            pl.BlockSpec((tm, C_in), lambda i: (i, 0)),
            # x is resident: constant block index -> DMA'd once.
            pl.BlockSpec((C_in, cols), lambda i: (0, 0)),
        ],
        out_specs=pl.BlockSpec((tm, cols), lambda i: (i, 0)),
        compiler_params=pltpu.CompilerParams(
            dimension_semantics=("parallel",),
        ),
        cost_estimate=cost,
    )(w_bf16, x_mat)

    if N == 1:
        # Free contiguous view back to NCHW.
        return out_mat.reshape(1, C_out, H, W)
    return jnp.transpose(out_mat.reshape(C_out, N, H, W), (1, 0, 2, 3))


if __name__ == "__main__":
    key = jax.random.PRNGKey(0)
    kx, kw = jax.random.split(key)

    # Shapes implied by the module: Conv2d(432, 432, 1x1) on (1, 432, 14, 14).
    N, C_in, H, W = 1, 432, 14, 14
    C_out = 432

    x = jax.random.normal(kx, (N, C_in, H, W), dtype=jnp.float32)
    # PyTorch weight shape (C_out, C_in, 1, 1), squeezed.
    weight = jax.random.normal(kw, (C_out, C_in), dtype=jnp.float32) * 0.02

    out = jax.block_until_ready(conv2d_1x1(x, weight))
    assert out.shape == (N, C_out, H, W)
    assert out.dtype == jnp.float32

    # Reference with the same bf16-operand / f32-accumulate numerics.
    ref_bf16 = jnp.einsum(
        "nchw,oc->nohw",
        x.astype(jnp.bfloat16),
        weight.astype(jnp.bfloat16),
        preferred_element_type=jnp.float32,
    )
    assert jnp.allclose(out, ref_bf16, atol=1e-3, rtol=1e-3), float(
        jnp.max(jnp.abs(out - ref_bf16))
    )

    # Loose sanity check against the full-f32 reference (bf16 operand rounding).
    ref_f32 = jnp.einsum("nchw,oc->nohw", x, weight)
    assert jnp.allclose(out, ref_f32, atol=3e-2, rtol=3e-2), float(
        jnp.max(jnp.abs(out - ref_f32))
    )

    print("KERNEL_OK")
</pallas_src>

<mosaic_0001>
module attributes {stable_mosaic.version = 11 : i64} {
  func.func @conv1x1_kernel(%arg0: i32, %arg1: memref<144x432xbf16, #tpu.memory_space<vmem>>, %arg2: memref<432x196xf32, #tpu.memory_space<vmem>>, %arg3: memref<144x196xf32, #tpu.memory_space<vmem>>) attributes {dimension_semantics = [#tpu.dimension_semantics<parallel>], iteration_bounds = array<i64: 3>, scalar_prefetch = 0 : i64, scratch_operands = 0 : i64, tpu.core_type = #tpu.core_type<tc>, window_params = [{transform_indices = @transform_0, window_bounds = array<i64: 144, 432>}, {pipeline_mode = #tpu.pipeline_mode<synchronous>, transform_indices = @transform_1, window_bounds = array<i64: 432, 196>}, {transform_indices = @transform_2, window_bounds = array<i64: 144, 196>}]} {
    %c0 = arith.constant 0 : index
    %c0_0 = arith.constant 0 : index
    %0 = vector.load %arg2[%c0, %c0_0] : memref<432x196xf32, #tpu.memory_space<vmem>>, vector<432x196xf32>
    %1 = arith.truncf %0 : vector<432x196xf32> to vector<432x196xbf16>
    %c0_1 = arith.constant 0 : index
    %c0_2 = arith.constant 0 : index
    %2 = vector.load %arg1[%c0_1, %c0_2] : memref<144x432xbf16, #tpu.memory_space<vmem>>, vector<144x432xbf16>
    %cst = arith.constant dense<0.000000e+00> : vector<144x196xf32>
    %3 = tpu.matmul %2, %1, %cst {dimension_numbers = #tpu.dot_dimension_numbers<[1], [0], [0], [1], [0, 0, 1, 1], [], []>} : vector<144x432xbf16>, vector<432x196xbf16>, vector<144x196xf32> -> vector<144x196xf32>
    %c0_3 = arith.constant 0 : index
    %c0_4 = arith.constant 0 : index
    %4 = vector.load %arg3[%c0_3, %c0_4] : memref<144x196xf32, #tpu.memory_space<vmem>>, vector<144x196xf32>
    tpu.vector_store %arg3[%c0_3, %c0_4], %3 {strides = array<i32>} : memref<144x196xf32, #tpu.memory_space<vmem>>, vector<144x196xf32>,
    return
  }
  func.func @transform_0(%arg0: i32) -> (i32, i32) {
    %c0_i32 = arith.constant 0 : i32
    %c0_i32_0 = arith.constant 0 : i32
    return %arg0, %c0_i32 : i32, i32
  }
  func.func @transform_1(%arg0: i32) -> (i32, i32) {
    %c0_i32 = arith.constant 0 : i32
    %c0_i32_0 = arith.constant 0 : i32
    %c0_i32_1 = arith.constant 0 : i32
    return %c0_i32, %c0_i32_0 : i32, i32
  }
  func.func @transform_2(%arg0: i32) -> (i32, i32) {
    %c0_i32 = arith.constant 0 : i32
    %c0_i32_0 = arith.constant 0 : i32
    return %arg0, %c0_i32 : i32, i32
  }
}

</mosaic_0001>

<bundles_post_ra>
// kernel: tpu_custom_call.1
= control target key start
LH: loop header
LB: loop body
LE: loop exit
PB: predicated region body
PF: predicated region fallthrough
CT: control target
= control target key end

     0   :  { %s1034_s9 = smov 0   ;;  %s1493_s0 = inlined_call_operand.vmem [shape: bf16[432,432], index: 0, kind: input, shape index: {}]   ;;  %s1494_s1 = inlined_call_operand.vmem [shape: f32[432,196], index: 1, kind: input, shape index: {}]   ;;  %s1495_s2 = inlined_call_operand.vmem [shape: f32[432,196], index: 2, kind: output, shape index: {}]  }
   0x1 LB: > { %s891_s10 = sadd.s32 4294967295, %s1017_s9   ;;  %p895_p0 = scmp.ge.s32.totalorder %s1017_s9, 1  ;;  %s1017_s9 = sphi %s1034_s9, %s12_s9  }
   0x2   : > { %p114_p1 = scmp.lt.s32.totalorder %s1017_s9, 4 }
   0x4   : > { %p115_p2 = pnand %p895_p0, %p114_p1 }
   0x5   : > { %s1173_s19 = smul.u32 (!%p115_p2), 18, %s891_s10 }
   0x6   : > { %118 = sbr.rel (%p115_p2) target bundleno = 344 (0x158), region = 28 }
   0x7   : > { %p139_p3 = scmp.lt.s32.totalorder (!%p115_p2), %s1173_s19, 53 }
   0xb   : > { %v182_v0 = vld [vmem:[%s1494_s1 + $0xe8] sm:$0xff]  ;;  %v184_v1 = vld [vmem:[%s1494_s1 + $0xf8] sm:$0xff]  ;;  %v181_v2 = vld [vmem:[%s1494_s1 + $0xe0] sm:$0xff]  ;;  %s1497_s19 = smov (!%p139_p3, %s1173_s19), 53  ;;  %vm522_vm0 = vcmask 392192   ;;  %vm797_vm1 = vcmask 556032  }
   0xc   : > { %v276_v3 = vpack.c.bf16 %v184_v1, %v182_v0  ;;  %v183_v4 = vld [vmem:[%s1494_s1 + $0xf0] sm:$0xff]  ;;  %v178_v5 = vld [vmem:[%s1494_s1 + $0xc8] sm:$0xff]  ;;  %v180_v6 = vld [vmem:[%s1494_s1 + $0xd8] sm:$0xff]  ;;  %s947_s15 = sshll.u32 %s1497_s19, 4 }
   0xd   : > { %v275_v7 = vpack.c.bf16 %v183_v4, %v181_v2  ;;  %v274_v8 = vpack.c.bf16 %v180_v6, %v178_v5  ;;  %v177_v9 = vld [vmem:[%s1494_s1 + $0xc0] sm:$0xff]  ;;  %v179_v10 = vld [vmem:[%s1494_s1 + $0xd0] sm:$0xff]  ;;  %v174_v11 = vld [vmem:[%s1494_s1 + $0xa8] sm:$0xff]  ;;  %s1280_s4 = scalar_lea.vmem %s1493_s0, %s947_s15  ;;  %s1434_s30 = scalar_lea.vmem %s1495_s2, %s947_s15 }
   0xe   : > { %550 = vmatprep.subr.bf16.mxu0 %v276_v3  ;;  %v176_v12 = vld [vmem:[%s1494_s1 + $0xb8] sm:$0xff]  ;;  %v273_v13 = vpack.c.bf16 %v179_v10, %v177_v9  ;;  %v173_v14 = vld [vmem:[%s1494_s1 + $0xa0] sm:$0xff]  ;;  %v175_v15 = vld [vmem:[%s1494_s1 + $0xb0] sm:$0xff] }
   0xf   : > { %551 = vmatpush1.bf16.msra.mxu0 %v275_v7  ;;  %v272_v16 = vpack.c.bf16 %v176_v12, %v174_v11  ;;  %v170_v17 = vld [vmem:[%s1494_s1 + $0x88] sm:$0xff]  ;;  %v248_v19 = vld [vmem:[%s1494_s1 + $0x2f8] sm:$0xff]  ;;  %v245_v22 = vld [vmem:[%s1494_s1 + $0x2e0] sm:$0xff]  ;;  %v271_v25 = vpack.c.bf16 %v175_v15, %v173_v14 }
  0x10   : > { %552 = vmatprep.subr.bf16.mxu0 %v274_v8  ;;  %v246_v18 = vld [vmem:[%s1494_s1 + $0x2e8] sm:$0xff]  ;;  %v172_v20 = vld [vmem:[%s1494_s1 + $0x98] sm:$0xff]  ;;  %v247_v23 = vld [vmem:[%s1494_s1 + $0x2f0] sm:$0xff] }
  0x11   : > { %v308_v21 = vpack.c.bf16 %v248_v19, %v246_v18  ;;  %v307_v24 = vpack.c.bf16 %v247_v23, %v245_v22  ;;  %v242_v26 = vld [vmem:[%s1494_s1 + $0x2c8] sm:$0xff]  ;;  %v244_v27 = vld [vmem:[%s1494_s1 + $0x2d8] sm:$0xff]  ;;  %v241_v28 = vld [vmem:[%s1494_s1 + $0x2c0] sm:$0xff]  ;;  %v270_v29 = vpack.c.bf16 %v172_v20, %v170_v17 }
  0x12   : > { %v169_v30 = vld [vmem:[%s1494_s1 + $0x80] sm:$0xff]  ;;  %v171_v31 = vld [vmem:[%s1494_s1 + $0x90] sm:$0xff]  ;;  %v306_v32 = vpack.c.bf16 %v244_v27, %v242_v26  ;;  %v166_v34 = vld [vmem:[%s1494_s1 + $0x68] sm:$0xff] }
  0x13   : > { %553 = vmatpush1.bf16.msra.mxu0 %v273_v13  ;;  %673 = vmatprep.subr.bf16.mxu1 %v308_v21  ;;  %v243_v33 = vld [vmem:[%s1494_s1 + $0x2d0] sm:$0xff]  ;;  %v168_v35 = vld [vmem:[%s1494_s1 + $0x78] sm:$0xff]  ;;  %v238_v37 = vld [vmem:[%s1494_s1 + $0x2a8] sm:$0xff]  ;;  %v269_v41 = vpack.c.bf16 %v171_v31, %v169_v30 }
  0x14   : > { %554 = vmatprep.subr.bf16.mxu0 %v272_v16  ;;  %674 = vmatpush1.bf16.msra.mxu1 %v307_v24  ;;  %v305_v36 = vpack.c.bf16 %v243_v33, %v241_v28  ;;  %v240_v38 = vld [vmem:[%s1494_s1 + $0x2b8] sm:$0xff]  ;;  %v237_v39 = vld [vmem:[%s1494_s1 + $0x2a0] sm:$0xff]  ;;  %v239_v40 = vld [vmem:[%s1494_s1 + $0x2b0] sm:$0xff]  ;;  %v268_v45 = vpack.c.bf16 %v168_v35, %v166_v34 }
  0x15   : > { %675 = vmatprep.subr.bf16.mxu1 %v306_v32  ;;  %v165_v42 = vld [vmem:[%s1494_s1 + $0x60] sm:$0xff]  ;;  %v167_v43 = vld [vmem:[%s1494_s1 + $0x70] sm:$0xff]  ;;  %v304_v44 = vpack.c.bf16 %v240_v38, %v238_v37  ;;  %v162_v46 = vld [vmem:[%s1494_s1 + $0x48] sm:$0xff]  ;;  %v303_v47 = vpack.c.bf16 %v239_v40, %v237_v39 }
  0x16   : > { %v234_v48 = vld [vmem:[%s1494_s1 + $0x288] sm:$0xff]  ;;  %v236_v49 = vld [vmem:[%s1494_s1 + $0x298] sm:$0xff]  ;;  %v233_v52 = vld [vmem:[%s1494_s1 + $0x280] sm:$0xff]  ;;  %v267_v54 = vpack.c.bf16 %v167_v43, %v165_v42 }
  0x17   : > { %555 = vmatpush1.bf16.msra.mxu0 %v271_v25  ;;  %v164_v50 = vld [vmem:[%s1494_s1 + $0x58] sm:$0xff]  ;;  %v302_v51 = vpack.c.bf16 %v236_v49, %v234_v48  ;;  %v235_v53 = vld [vmem:[%s1494_s1 + $0x290] sm:$0xff]  ;;  %v230_v55 = vld [vmem:[%s1494_s1 + $0x268] sm:$0xff] }
  0x18   : > { %556 = vmatprep.subr.bf16.mxu0 %v270_v29  ;;  %676 = vmatpush1.bf16.msra.mxu1 %v305_v36  ;;  %v232_v56 = vld [vmem:[%s1494_s1 + $0x278] sm:$0xff]  ;;  %v266_v57 = vpack.c.bf16 %v164_v50, %v162_v46  ;;  %v161_v58 = vld [vmem:[%s1494_s1 + $0x40] sm:$0xff]  ;;  %v163_v59 = vld [vmem:[%s1494_s1 + $0x50] sm:$0xff]  ;;  %v301_v61 = vpack.c.bf16 %v235_v53, %v233_v52 }
  0x19   : > { %677 = vmatprep.subr.bf16.mxu1 %v304_v44  ;;  %v158_v60 = vld [vmem:[%s1494_s1 + $0x28] sm:$0xff]  ;;  %v160_v62 = vld [vmem:[%s1494_s1 + $0x38] sm:$0xff]  ;;  %v300_v63 = vpack.c.bf16 %v232_v56, %v230_v55  ;;  %v229_v0 = vld [vmem:[%s1494_s1 + $0x260] sm:$0xff]  ;;  %v265_v4 = vpack.c.bf16 %v163_v59, %v161_v58 }
  0x1a   : > { %v231_v1 = vld [vmem:[%s1494_s1 + $0x270] sm:$0xff]  ;;  %v226_v2 = vld [vmem:[%s1494_s1 + $0x248] sm:$0xff]  ;;  %v228_v3 = vld [vmem:[%s1494_s1 + $0x258] sm:$0xff]  ;;  %v264_v5 = vpack.c.bf16 %v160_v62, %v158_v60 }
  0x1b   : > { %557 = vmatpush1.bf16.msra.mxu0 %v269_v41  ;;  %v157_v6 = vld [vmem:[%s1494_s1 + $0x20] sm:$0xff]  ;;  %v159_v7 = vld [vmem:[%s1494_s1 + $0x30] sm:$0xff]  ;;  %v154_v8 = vld [vmem:[%s1494_s1 + $0x8] sm:$0xff]  ;;  %v299_v9 = vpack.c.bf16 %v231_v1, %v229_v0  ;;  %v298_v11 = vpack.c.bf16 %v228_v3, %v226_v2 }
  0x1c   : > { %558 = vmatprep.subr.bf16.mxu0 %v268_v45  ;;  %678 = vmatpush1.bf16.msra.mxu1 %v303_v47  ;;  %v156_v10 = vld [vmem:[%s1494_s1 + $0x18] sm:$0xff]  ;;  %v225_v12 = vld [vmem:[%s1494_s1 + $0x240] sm:$0xff]  ;;  %v227_v13 = vld [vmem:[%s1494_s1 + $0x250] sm:$0xff]  ;;  %v263_v16 = vpack.c.bf16 %v159_v7, %v157_v6 }
  0x1d   : > { %679 = vmatprep.subr.bf16.mxu1 %v302_v51  ;;  %v222_v14 = vld [vmem:[%s1494_s1 + $0x228] sm:$0xff]  ;;  %v224_v15 = vld [vmem:[%s1494_s1 + $0x238] sm:$0xff]  ;;  %v262_v17 = vpack.c.bf16 %v156_v10, %v154_v8  ;;  %v153_v18 = vld [vmem:[%s1494_s1] sm:$0xff]  ;;  %v297_v21 = vpack.c.bf16 %v227_v13, %v225_v12 }
  0x1e   : > { %v155_v19 = vld [vmem:[%s1494_s1 + $0x10] sm:$0xff]  ;;  %v214_v20 = vld [vmem:[%s1494_s1 + $0x1e8] sm:$0xff]  ;;  %v216_v22 = vld [vmem:[%s1494_s1 + $0x1f8] sm:$0xff]  ;;  %v296_v23 = vpack.c.bf16 %v224_v15, %v222_v14 }
  0x1f   : > { %559 = vmatpush1.bf16.msra.mxu0 %v267_v54  ;;  %v221_v24 = vld [vmem:[%s1494_s1 + $0x220] sm:$0xff]  ;;  %v223_v25 = vld [vmem:[%s1494_s1 + $0x230] sm:$0xff]  ;;  %v218_v26 = vld [vmem:[%s1494_s1 + $0x208] sm:$0xff]  ;;  %v261_v28 = vpack.c.bf16 %v155_v19, %v153_v18  ;;  %v292_v29 = vpack.c.bf16 %v216_v22, %v214_v20 }
  0x20   : > { %560 = vmatprep.subr.bf16.mxu0 %v266_v57  ;;  %680 = vmatpush1.bf16.msra.mxu1 %v301_v61  ;;  %v220_v27 = vld [vmem:[%s1494_s1 + $0x218] sm:$0xff]  ;;  %v213_v30 = vld [vmem:[%s1494_s1 + $0x1e0] sm:$0xff]  ;;  %v215_v31 = vld [vmem:[%s1494_s1 + $0x1f0] sm:$0xff]  ;;  %v295_v33 = vpack.c.bf16 %v223_v25, %v221_v24 }
  0x21   : > { %681 = vmatprep.subr.bf16.mxu1 %v300_v63  ;;  %v210_v32 = vld [vmem:[%s1494_s1 + $0x1c8] sm:$0xff]  ;;  %v212_v34 = vld [vmem:[%s1494_s1 + $0x1d8] sm:$0xff]  ;;  %v294_v35 = vpack.c.bf16 %v220_v27, %v218_v26  ;;  %v217_v36 = vld [vmem:[%s1494_s1 + $0x200] sm:$0xff]  ;;  %v291_v40 = vpack.c.bf16 %v215_v31, %v213_v30 }
  0x22   : > { %v219_v37 = vld [vmem:[%s1494_s1 + $0x210] sm:$0xff]  ;;  %v258_v38 = vld [vmem:[%s1494_s1 + $0x348] sm:$0xff]  ;;  %v260_v39 = vld [vmem:[%s1494_s1 + $0x358] sm:$0xff]  ;;  %v290_v43 = vpack.c.bf16 %v212_v34, %v210_v32 }
  0x23   : > { %561 = vmatpush1.bf16.msra.mxu0 %v265_v4  ;;  %v209_v41 = vld [vmem:[%s1494_s1 + $0x1c0] sm:$0xff]  ;;  %v211_v42 = vld [vmem:[%s1494_s1 + $0x1d0] sm:$0xff]  ;;  %v206_v44 = vld [vmem:[%s1494_s1 + $0x1a8] sm:$0xff]  ;;  %v293_v46 = vpack.c.bf16 %v219_v37, %v217_v36  ;;  %v314_v48 = vpack.c.bf16 %v260_v39, %v258_v38 }
  0x24   : > { %562 = vmatprep.subr.bf16.mxu0 %v264_v5  ;;  %682 = vmatpush1.bf16.msra.mxu1 %v299_v9  ;;  %v208_v45 = vld [vmem:[%s1494_s1 + $0x1b8] sm:$0xff]  ;;  %v257_v47 = vld [vmem:[%s1494_s1 + $0x340] sm:$0xff]  ;;  %v259_v49 = vld [vmem:[%s1494_s1 + $0x350] sm:$0xff]  ;;  %v289_v54 = vpack.c.bf16 %v211_v42, %v209_v41 }
  0x25   : > { %683 = vmatprep.subr.bf16.mxu1 %v298_v11  ;;  %v254_v50 = vld [vmem:[%s1494_s1 + $0x328] sm:$0xff]  ;;  %v205_v51 = vld [vmem:[%s1494_s1 + $0x1a0] sm:$0xff]  ;;  %v256_v52 = vld [vmem:[%s1494_s1 + $0x338] sm:$0xff]  ;;  %v288_v58 = vpack.c.bf16 %v208_v45, %v206_v44  ;;  %v313_v59 = vpack.c.bf16 %v259_v49, %v257_v47 }
  0x26   : > { %v959_v53 = vld [vmem:[%s1280_s4 + $0xc] ss:$16 sps:$4 sm:$0xff]   ;;  %v207_v55 = vld [vmem:[%s1494_s1 + $0x1b0] sm:$0xff]  ;;  %v253_v60 = vld [vmem:[%s1494_s1 + $0x320] sm:$0xff]  ;;  %v312_v61 = vpack.c.bf16 %v256_v52, %v254_v50 }
  0x27   : > { %563 = vmatpush1.bf16.msra.mxu0 %v263_v16  ;;  %v202_v56 = vld [vmem:[%s1494_s1 + $0x188] sm:$0xff]  ;;  %v204_v57 = vld [vmem:[%s1494_s1 + $0x198] sm:$0xff]  ;;  %v255_v62 = vld [vmem:[%s1494_s1 + $0x330] sm:$0xff]  ;;  %936 = vmatprep.mubr.msk.bf16.mxu1 %vm522_vm0, %v959_v53  ;;  %v287_v4 = vpack.c.bf16 %v207_v55, %v205_v51 }
  0x28   : > { %564 = vmatprep.subr.bf16.mxu0 %v262_v17  ;;  %684 = vmatpush1.bf16.msra.mxu1 %v297_v21  ;;  %v962_v63 = vld [vmem:[%s1280_s4 + $0x4] ss:$16 sps:$4 sm:$0xff]   ;;  %v250_v2 = vld [vmem:[%s1494_s1 + $0x308] sm:$0xff]  ;;  %v252_v3 = vld [vmem:[%s1494_s1 + $0x318] sm:$0xff]  ;;  %v286_v6 = vpack.c.bf16 %v204_v57, %v202_v56  ;;  %v311_v8 = vpack.c.bf16 %v255_v62, %v253_v60 }
  0x29   : > { %685 = vmatprep.subr.bf16.mxu1 %v296_v23  ;;  %v201_v0 = vld [vmem:[%s1494_s1 + $0x180] sm:$0xff]  ;;  %v203_v1 = vld [vmem:[%s1494_s1 + $0x190] sm:$0xff]  ;;  %v198_v5 = vld [vmem:[%s1494_s1 + $0x168] sm:$0xff]  ;;  %582 = vmatprep.mubr.bf16.mxu0 %v962_v63  ;;  %v310_v9 = vpack.c.bf16 %v252_v3, %v250_v2 }
  0x2a   : > { %v200_v7 = vld [vmem:[%s1494_s1 + $0x178] sm:$0xff]  ;;  %v249_v10 = vld [vmem:[%s1494_s1 + $0x300] sm:$0xff]  ;;  %v251_v11 = vld [vmem:[%s1494_s1 + $0x310] sm:$0xff]  ;;  %v285_v12 = vpack.c.bf16 %v203_v1, %v201_v0 }
  0x2b   : > { %565 = vmatpush1.bf16.msra.mxu0 %v261_v28  ;;  %v197_v13 = vld [vmem:[%s1494_s1 + $0x160] sm:$0xff]  ;;  %v284_v14 = vpack.c.bf16 %v200_v7, %v198_v5  ;;  %v199_v15 = vld [vmem:[%s1494_s1 + $0x170] sm:$0xff]  ;;  %v309_v16 = vpack.c.bf16 %v251_v11, %v249_v10  ;;  %v194_v17 = vld [vmem:[%s1494_s1 + $0x148] sm:$0xff] }
  0x2c   : > { %566 = vmatprep.subr.bf16.mxu0 %v292_v29  ;;  %686 = vmatpush1.bf16.msra.mxu1 %v295_v33  ;;  %v196_v18 = vld [vmem:[%s1494_s1 + $0x158] sm:$0xff]  ;;  %v193_v19 = vld [vmem:[%s1494_s1 + $0x140] sm:$0xff]  ;;  %v195_v20 = vld [vmem:[%s1494_s1 + $0x150] sm:$0xff]  ;;  %v283_v21 = vpack.c.bf16 %v199_v15, %v197_v13 }
  0x2d   : > { %687 = vmatprep.subr.bf16.mxu1 %v294_v35  ;;  %v957_v22 = vld [vmem:[%s1280_s4 + $0x8] ss:$16 sps:$4 sm:$0xff]   ;;  %v282_v23 = vpack.c.bf16 %v196_v18, %v194_v17  ;;  %v963_v24 = vld [vmem:[%s1280_s4 + $0x2c] ss:$16 sps:$4 sm:$0xff]   ;;  %v281_v27 = vpack.c.bf16 %v195_v20, %v193_v19  ;;  %v189_v28 = vld [vmem:[%s1494_s1 + $0x120] sm:$0xff] }
  0x2e   : > { %v190_v25 = vld [vmem:[%s1494_s1 + $0x128] sm:$0xff]  ;;  %v192_v26 = vld [vmem:[%s1494_s1 + $0x138] sm:$0xff]  ;;  %v191_v30 = vld [vmem:[%s1494_s1 + $0x130] sm:$0xff] }
  0x2f   : > { %567 = vmatpush2.bf16.msra.mxu0 %v291_v40  ;;  %v280_v29 = vpack.c.bf16 %v192_v26, %v190_v25  ;;  %v186_v31 = vld [vmem:[%s1494_s1 + $0x108] sm:$0xff]  ;;  %v188_v32 = vld [vmem:[%s1494_s1 + $0x118] sm:$0xff]  ;;  %v185_v33 = vld [vmem:[%s1494_s1 + $0x100] sm:$0xff]  ;;  %v279_v35 = vpack.c.bf16 %v191_v30, %v189_v28 }
  0x30   : > { %568 = vmatprep.subr.bf16.mxu0 %v290_v43  ;;  %688 = vmatpush1.bf16.msra.mxu1 %v293_v46  ;;  %v187_v34 = vld [vmem:[%s1494_s1 + $0x110] sm:$0xff]  ;;  %v965_v36 = vld [vmem:[%s1280_s4 + $0x28] ss:$16 sps:$4 sm:$0xff]   ;;  %v278_v37 = vpack.c.bf16 %v188_v32, %v186_v31  ;;  %v969_v38 = vld [vmem:[%s1280_s4 + $0x4c] ss:$16 sps:$4 sm:$0xff]  }
  0x31   : > { %699 = vmatprep.subr.bf16.mxu1 %v314_v48  ;;  %v277_v39 = vpack.c.bf16 %v187_v34, %v185_v33  ;;  %v960_v40 = vld [vmem:[%s1280_s4] ss:$16 sps:$4 sm:$0xff]   ;;  %v966_v41 = vld [vmem:[%s1280_s4 + $0x24] ss:$16 sps:$4 sm:$0xff]   ;;  %v971_v42 = vld [vmem:[%s1280_s4 + $0x48] ss:$16 sps:$4 sm:$0xff]  }
  0x32   : > { %v975_v43 = vld [vmem:[%s1280_s4 + $0x6c] ss:$16 sps:$4 sm:$0xff]   ;;  %v968_v44 = vld [vmem:[%s1280_s4 + $0x20] ss:$16 sps:$4 sm:$0xff]   ;;  %v972_v45 = vld [vmem:[%s1280_s4 + $0x44] ss:$16 sps:$4 sm:$0xff]  }
  0x33   : > { %569 = vmatpush2.bf16.msra.mxu0 %v289_v54  ;;  %v977_v46 = vld [vmem:[%s1280_s4 + $0x68] ss:$16 sps:$4 sm:$0xff]   ;;  %v981_v47 = vld [vmem:[%s1280_s4 + $0x8c] ss:$16 sps:$4 sm:$0xff]   ;;  %v974_v48 = vld [vmem:[%s1280_s4 + $0x40] ss:$16 sps:$4 sm:$0xff]  }
  0x34   : > { %570 = vmatprep.subr.bf16.mxu0 %v288_v58  ;;  %700 = vmatpush2.bf16.msra.mxu1 %v313_v59  ;;  %v978_v49 = vld [vmem:[%s1280_s4 + $0x64] ss:$16 sps:$4 sm:$0xff]   ;;  %v983_v50 = vld [vmem:[%s1280_s4 + $0x88] ss:$16 sps:$4 sm:$0xff]   ;;  %v987_v51 = vld [vmem:[%s1280_s4 + $0xac] ss:$16 sps:$4 sm:$0xff]  }
  0x35   : > { %701 = vmatprep.subr.bf16.mxu1 %v312_v61  ;;  %v980_v52 = vld [vmem:[%s1280_s4 + $0x60] ss:$16 sps:$4 sm:$0xff]   ;;  %v984_v53 = vld [vmem:[%s1280_s4 + $0x84] ss:$16 sps:$4 sm:$0xff]   ;;  %v989_v54 = vld [vmem:[%s1280_s4 + $0xa8] ss:$16 sps:$4 sm:$0xff]  }
  0x36   : > { %v993_v55 = vld [vmem:[%s1280_s4 + $0xcc] ss:$16 sps:$4 sm:$0xff]   ;;  %v986_v56 = vld [vmem:[%s1280_s4 + $0x80] ss:$16 sps:$4 sm:$0xff]   ;;  %v990_v57 = vld [vmem:[%s1280_s4 + $0xa4] ss:$16 sps:$4 sm:$0xff]  }
  0x37   : > { %571 = vmatpush2.bf16.msra.mxu0 %v287_v4  ;;  %v995_v58 = vld [vmem:[%s1280_s4 + $0xc8] ss:$16 sps:$4 sm:$0xff]   ;;  %v999_v59 = vld [vmem:[%s1280_s4 + $0xec] ss:$16 sps:$4 sm:$0xff]   ;;  %v992_v60 = vld [vmem:[%s1280_s4 + $0xa0] ss:$16 sps:$4 sm:$0xff]  }
  0x38   : > { %572 = vmatprep.subr.bf16.mxu0 %v286_v6  ;;  %702 = vmatpush2.bf16.msra.mxu1 %v311_v8  ;;  %v996_v61 = vld [vmem:[%s1280_s4 + $0xc4] ss:$16 sps:$4 sm:$0xff]   ;;  %v1001_v62 = vld [vmem:[%s1280_s4 + $0xe8] ss:$16 sps:$4 sm:$0xff]   ;;  %v1005_v63 = vld [vmem:[%s1280_s4 + $0x10c] ss:$16 sps:$4 sm:$0xff]  }
  0x39   : > { %703 = vmatprep.subr.bf16.mxu1 %v310_v9  ;;  %v998_v0 = vld [vmem:[%s1280_s4 + $0xc0] ss:$16 sps:$4 sm:$0xff]   ;;  %v1002_v1 = vld [vmem:[%s1280_s4 + $0xe4] ss:$16 sps:$4 sm:$0xff]   ;;  %v1007_v2 = vld [vmem:[%s1280_s4 + $0x108] ss:$16 sps:$4 sm:$0xff]  }
  0x3a   : > { %v1004_v3 = vld [vmem:[%s1280_s4 + $0xe0] ss:$16 sps:$4 sm:$0xff]   ;;  %v1008_v4 = vld [vmem:[%s1280_s4 + $0x104] ss:$16 sps:$4 sm:$0xff]  }
  0x3b   : > { %573 = vmatpush2.bf16.msra.mxu0 %v285_v12  ;;  %v1010_v5 = vld [vmem:[%s1280_s4 + $0x100] ss:$16 sps:$4 sm:$0xff]  }
  0x3c   : > { %574 = vmatprep.subr.bf16.mxu0 %v284_v14  ;;  %704 = vmatpush2.bf16.msra.mxu1 %v309_v16 }
  0x3f   : > { %575 = vmatpush2.bf16.msra.mxu0 %v283_v21  ;;  %706 = vmatmul.mubr.bf16.vlgmr.msra.gmra.mxu1 %v957_v22 }
  0x40   : > { %576 = vmatprep.subr.bf16.mxu0 %v282_v23  ;;  %937 = vmatprep.mubr.msk.bf16.mxu1 %vm522_vm0, %v963_v24 }
  0x43   : > { %577 = vmatpush2.bf16.msra.mxu0 %v281_v27 }
  0x44   : > { %578 = vmatprep.subr.bf16.mxu0 %v280_v29 }
  0x47   : > { %579 = vmatpush2.bf16.msra.mxu0 %v279_v35  ;;  %716 = vmatmul.mubr.bf16.gmra.mxu1 %v965_v36 }
  0x48   : > { %580 = vmatprep.subr.bf16.mxu0 %v278_v37  ;;  %938 = vmatprep.mubr.msk.bf16.mxu1 %vm522_vm0, %v969_v38 }
  0x4b   : > { %581 = vmatpush2.bf16.msra.mxu0 %v277_v39 }
  0x4e   : > { %583 = vmatmul.mubr.bf16.vlgmr.msra.gmra.mxu0 %v960_v40 }
  0x4f   : > { %592 = vmatprep.mubr.bf16.mxu0 %v966_v41  ;;  %726 = vmatmul.mubr.bf16.gmra.mxu1 %v971_v42 }
  0x50   : > { %939 = vmatprep.mubr.msk.bf16.mxu1 %vm522_vm0, %v975_v43 }
  0x56   : > { %593 = vmatmul.mubr.bf16.gmra.mxu0 %v968_v44 }
  0x57   : > { %602 = vmatprep.mubr.bf16.mxu0 %v972_v45  ;;  %736 = vmatmul.mubr.bf16.gmra.mxu1 %v977_v46 }
  0x58   : > { %940 = vmatprep.mubr.msk.bf16.mxu1 %vm522_vm0, %v981_v47 }
  0x5e   : > { %603 = vmatmul.mubr.bf16.gmra.mxu0 %v974_v48 }
  0x5f   : > { %612 = vmatprep.mubr.bf16.mxu0 %v978_v49  ;;  %746 = vmatmul.mubr.bf16.gmra.mxu1 %v983_v50 }
  0x60   : > { %941 = vmatprep.mubr.msk.bf16.mxu1 %vm522_vm0, %v987_v51 }
  0x66   : > { %613 = vmatmul.mubr.bf16.gmra.mxu0 %v980_v52 }
  0x67   : > { %622 = vmatprep.mubr.bf16.mxu0 %v984_v53  ;;  %756 = vmatmul.mubr.bf16.gmra.mxu1 %v989_v54 }
  0x68   : > { %942 = vmatprep.mubr.msk.bf16.mxu1 %vm522_vm0, %v993_v55 }
  0x6e   : > { %623 = vmatmul.mubr.bf16.gmra.mxu0 %v986_v56 }
  0x6f   : > { %632 = vmatprep.mubr.bf16.mxu0 %v990_v57  ;;  %766 = vmatmul.mubr.bf16.gmra.mxu1 %v995_v58 }
  0x70   : > { %943 = vmatprep.mubr.msk.bf16.mxu1 %vm522_vm0, %v999_v59 }
  0x76   : > { %633 = vmatmul.mubr.bf16.gmra.mxu0 %v992_v60 }
  0x77   : > { %642 = vmatprep.mubr.bf16.mxu0 %v996_v61  ;;  %776 = vmatmul.mubr.bf16.gmra.mxu1 %v1001_v62 }
  0x78   : > { %944 = vmatprep.mubr.msk.bf16.mxu1 %vm522_vm0, %v1005_v63 }
  0x7e   : > { %643 = vmatmul.mubr.bf16.gmra.mxu0 %v998_v0 }
  0x7f   : > { %652 = vmatprep.mubr.bf16.mxu0 %v1002_v1  ;;  %786 = vmatmul.mubr.bf16.gmra.mxu1 %v1007_v2 }
  0x86   : > { %653 = vmatmul.mubr.bf16.gmra.mxu0 %v1004_v3 }
  0x87   : > { %662 = vmatprep.mubr.bf16.mxu0 %v1008_v4 }
  0x8e   : > { %663 = vmatmul.mubr.bf16.gmra.mxu0 %v1010_v5 }
  0xff   : > { %v707_v6 = vpop.f32.mrf.mxu1 }
 0x101   : > { %v709_v7 = vpop.f32.mrf.mxu1 }
 0x103   : > { %v711_v8 = vpop.f32.mrf.mxu1 }
 0x105   : > { %v713_v9 = vpop.f32.mrf.mxu1 }
 0x107   : > { %v717_v10 = vpop.f32.mrf.mxu1 }
 0x109   : > { %v719_v11 = vpop.f32.mrf.mxu1 }
 0x10b   : > { %v721_v12 = vpop.f32.mrf.mxu1 }
 0x10d   : > { %v723_v13 = vpop.f32.mrf.mxu1 }
 0x10e   : > { %v584_v14 = vpop.f32.mrf.mxu0 }
 0x10f   : > { %v708_v15 = vadd.f32 %v707_v6, %v584_v14  ;;  %v727_v16 = vpop.f32.mrf.mxu1 }
 0x110   : > { %v586_v17 = vpop.f32.mrf.mxu0 }
 0x111   : > { %796 = vst [vmem:[%s1434_s30] sm:$0xff] %v708_v15  ;;  %v710_v18 = vadd.f32 %v709_v7, %v586_v17  ;;  %v729_v19 = vpop.f32.mrf.mxu1 }
 0x112   : > { %v588_v20 = vpop.f32.mrf.mxu0 }
 0x113   : > { %798 = vst.msk [vmem:[%s1434_s30 + $0x8] sm:$0xff] %vm797_vm1, %v710_v18  ;;  %v712_v21 = vadd.f32 %v711_v8, %v588_v20  ;;  %v731_v22 = vpop.f32.mrf.mxu1 }
 0x114   : > { %v590_v23 = vpop.f32.mrf.mxu0 }
 0x115   : > { %799 = vst [vmem:[%s1434_s30 + $0x10] sm:$0xff] %v712_v21  ;;  %v714_v24 = vadd.f32 %v713_v9, %v590_v23  ;;  %v733_v25 = vpop.f32.mrf.mxu1 }
 0x116   : > { %v594_v26 = vpop.f32.mrf.mxu0 }
 0x117   : > { %800 = vst.msk [vmem:[%s1434_s30 + $0x18] sm:$0xff] %vm797_vm1, %v714_v24  ;;  %v718_v27 = vadd.f32 %v717_v10, %v594_v26  ;;  %v737_v28 = vpop.f32.mrf.mxu1 }
 0x118   : > { %v596_v29 = vpop.f32.mrf.mxu0 }
 0x119   : > { %801 = vst [vmem:[%s1434_s30 + $0x20] sm:$0xff] %v718_v27  ;;  %v720_v30 = vadd.f32 %v719_v11, %v596_v29  ;;  %v739_v31 = vpop.f32.mrf.mxu1 }
 0x11a   : > { %v598_v32 = vpop.f32.mrf.mxu0 }
 0x11b   : > { %802 = vst.msk [vmem:[%s1434_s30 + $0x28] sm:$0xff] %vm797_vm1, %v720_v30  ;;  %v722_v33 = vadd.f32 %v721_v12, %v598_v32  ;;  %v741_v34 = vpop.f32.mrf.mxu1 }
 0x11c   : > { %v600_v35 = vpop.f32.mrf.mxu0 }
 0x11d   : > { %803 = vst [vmem:[%s1434_s30 + $0x30] sm:$0xff] %v722_v33  ;;  %v724_v36 = vadd.f32 %v723_v13, %v600_v35  ;;  %v743_v37 = vpop.f32.mrf.mxu1 }
 0x11e   : > { %v604_v38 = vpop.f32.mrf.mxu0 }
 0x11f   : > { %804 = vst.msk [vmem:[%s1434_s30 + $0x38] sm:$0xff] %vm797_vm1, %v724_v36  ;;  %v728_v39 = vadd.f32 %v727_v16, %v604_v38  ;;  %v747_v40 = vpop.f32.mrf.mxu1 }
 0x120   : > { %v606_v41 = vpop.f32.mrf.mxu0 }
 0x121   : > { %805 = vst [vmem:[%s1434_s30 + $0x40] sm:$0xff] %v728_v39  ;;  %v730_v42 = vadd.f32 %v729_v19, %v606_v41  ;;  %v749_v43 = vpop.f32.mrf.mxu1 }
 0x122   : > { %v608_v44 = vpop.f32.mrf.mxu0 }
 0x123   : > { %806 = vst.msk [vmem:[%s1434_s30 + $0x48] sm:$0xff] %vm797_vm1, %v730_v42  ;;  %v732_v45 = vadd.f32 %v731_v22, %v608_v44  ;;  %v751_v46 = vpop.f32.mrf.mxu1 }
 0x124   : > { %v610_v47 = vpop.f32.mrf.mxu0 }
 0x125   : > { %807 = vst [vmem:[%s1434_s30 + $0x50] sm:$0xff] %v732_v45  ;;  %v734_v48 = vadd.f32 %v733_v25, %v610_v47  ;;  %v753_v49 = vpop.f32.mrf.mxu1 }
 0x126   : > { %v614_v50 = vpop.f32.mrf.mxu0 }
 0x127   : > { %808 = vst.msk [vmem:[%s1434_s30 + $0x58] sm:$0xff] %vm797_vm1, %v734_v48  ;;  %v738_v51 = vadd.f32 %v737_v28, %v614_v50  ;;  %v757_v52 = vpop.f32.mrf.mxu1 }
 0x128   : > { %v616_v53 = vpop.f32.mrf.mxu0 }
 0x129   : > { %809 = vst [vmem:[%s1434_s30 + $0x60] sm:$0xff] %v738_v51  ;;  %v740_v54 = vadd.f32 %v739_v31, %v616_v53  ;;  %v759_v55 = vpop.f32.mrf.mxu1 }
 0x12a   : > { %v618_v56 = vpop.f32.mrf.mxu0 }
 0x12b   : > { %810 = vst.msk [vmem:[%s1434_s30 + $0x68] sm:$0xff] %vm797_vm1, %v740_v54  ;;  %v742_v57 = vadd.f32 %v741_v34, %v618_v56  ;;  %v761_v58 = vpop.f32.mrf.mxu1 }
 0x12c   : > { %v620_v59 = vpop.f32.mrf.mxu0 }
 0x12d   : > { %811 = vst [vmem:[%s1434_s30 + $0x70] sm:$0xff] %v742_v57  ;;  %v744_v60 = vadd.f32 %v743_v37, %v620_v59  ;;  %v763_v61 = vpop.f32.mrf.mxu1 }
 0x12e   : > { %v624_v62 = vpop.f32.mrf.mxu0 }
 0x12f   : > { %812 = vst.msk [vmem:[%s1434_s30 + $0x78] sm:$0xff] %vm797_vm1, %v744_v60  ;;  %v748_v63 = vadd.f32 %v747_v40, %v624_v62  ;;  %v767_v0 = vpop.f32.mrf.mxu1 }
 0x130   : > { %v626_v1 = vpop.f32.mrf.mxu0 }
 0x131   : > { %813 = vst [vmem:[%s1434_s30 + $0x80] sm:$0xff] %v748_v63  ;;  %v750_v2 = vadd.f32 %v749_v43, %v626_v1  ;;  %v769_v3 = vpop.f32.mrf.mxu1 }
 0x132   : > { %v628_v4 = vpop.f32.mrf.mxu0 }
 0x133   : > { %814 = vst.msk [vmem:[%s1434_s30 + $0x88] sm:$0xff] %vm797_vm1, %v750_v2  ;;  %v752_v5 = vadd.f32 %v751_v46, %v628_v4  ;;  %v771_v6 = vpop.f32.mrf.mxu1 }
 0x134   : > { %v630_v7 = vpop.f32.mrf.mxu0 }
 0x135   : > { %815 = vst [vmem:[%s1434_s30 + $0x90] sm:$0xff] %v752_v5  ;;  %v754_v8 = vadd.f32 %v753_v49, %v630_v7  ;;  %v773_v9 = vpop.f32.mrf.mxu1 }
 0x136   : > { %v634_v10 = vpop.f32.mrf.mxu0 }
 0x137   : > { %816 = vst.msk [vmem:[%s1434_s30 + $0x98] sm:$0xff] %vm797_vm1, %v754_v8  ;;  %v758_v11 = vadd.f32 %v757_v52, %v634_v10  ;;  %v777_v13 = vpop.f32.mrf.mxu1 }
 0x138   : > { %v636_v12 = vpop.f32.mrf.mxu0 }
 0x139   : > { %817 = vst [vmem:[%s1434_s30 + $0xa0] sm:$0xff] %v758_v11  ;;  %v760_v14 = vadd.f32 %v759_v55, %v636_v12  ;;  %v779_v18 = vpop.f32.mrf.mxu1 }
 0x13a   : > { %v638_v15 = vpop.f32.mrf.mxu0 }
 0x13b   : > { %818 = vst.msk [vmem:[%s1434_s30 + $0xa8] sm:$0xff] %vm797_vm1, %v760_v14  ;;  %v762_v16 = vadd.f32 %v761_v58, %v638_v15  ;;  %v781_v23 = vpop.f32.mrf.mxu1 }
 0x13c   : > { %v640_v17 = vpop.f32.mrf.mxu0 }
 0x13d   : > { %819 = vst [vmem:[%s1434_s30 + $0xb0] sm:$0xff] %v762_v16  ;;  %v764_v19 = vadd.f32 %v763_v61, %v640_v17  ;;  %v783_v28 = vpop.f32.mrf.mxu1 }
 0x13e   : > { %v644_v20 = vpop.f32.mrf.mxu0 }
 0x13f   : > { %820 = vst.msk [vmem:[%s1434_s30 + $0xb8] sm:$0xff] %vm797_vm1, %v764_v19  ;;  %v768_v21 = vadd.f32 %v767_v0, %v644_v20  ;;  %v787_v33 = vpop.f32.mrf.mxu1 }
 0x140   : > { %v646_v22 = vpop.f32.mrf.mxu0 }
 0x141   : > { %821 = vst [vmem:[%s1434_s30 + $0xc0] sm:$0xff] %v768_v21  ;;  %v770_v24 = vadd.f32 %v769_v3, %v646_v22  ;;  %v789_v37 = vpop.f32.mrf.mxu1 }
 0x142   : > { %v648_v25 = vpop.f32.mrf.mxu0 }
 0x143   : > { %822 = vst.msk [vmem:[%s1434_s30 + $0xc8] sm:$0xff] %vm797_vm1, %v770_v24  ;;  %v772_v26 = vadd.f32 %v771_v6, %v648_v25  ;;  %v791_v42 = vpop.f32.mrf.mxu1 }
 0x144   : > { %v650_v27 = vpop.f32.mrf.mxu0 }
 0x145   : > { %823 = vst [vmem:[%s1434_s30 + $0xd0] sm:$0xff] %v772_v26  ;;  %v774_v29 = vadd.f32 %v773_v9, %v650_v27  ;;  %v793_v47 = vpop.f32.mrf.mxu1 }
 0x146   : > { %v654_v30 = vpop.f32.mrf.mxu0 }
 0x147   : > { %824 = vst.msk [vmem:[%s1434_s30 + $0xd8] sm:$0xff] %vm797_vm1, %v774_v29  ;;  %v778_v31 = vadd.f32 %v777_v13, %v654_v30 }
 0x148   : > { %v656_v32 = vpop.f32.mrf.mxu0 }
 0x149   : > { %825 = vst [vmem:[%s1434_s30 + $0xe0] sm:$0xff] %v778_v31  ;;  %v780_v34 = vadd.f32 %v779_v18, %v656_v32 }
 0x14a   : > { %v658_v35 = vpop.f32.mrf.mxu0 }
 0x14b   : > { %826 = vst.msk [vmem:[%s1434_s30 + $0xe8] sm:$0xff] %vm797_vm1, %v780_v34  ;;  %v782_v36 = vadd.f32 %v781_v23, %v658_v35 }
 0x14c   : > { %v660_v38 = vpop.f32.mrf.mxu0 }
 0x14d   : > { %827 = vst [vmem:[%s1434_s30 + $0xf0] sm:$0xff] %v782_v36  ;;  %v784_v39 = vadd.f32 %v783_v28, %v660_v38 }
 0x14e   : > { %v664_v40 = vpop.f32.mrf.mxu0 }
 0x14f   : > { %828 = vst.msk [vmem:[%s1434_s30 + $0xf8] sm:$0xff] %vm797_vm1, %v784_v39  ;;  %v788_v41 = vadd.f32 %v787_v33, %v664_v40 }
 0x150   : > { %v666_v43 = vpop.f32.mrf.mxu0 }
 0x151   : > { %829 = vst [vmem:[%s1434_s30 + $0x100] sm:$0xff] %v788_v41  ;;  %v790_v44 = vadd.f32 %v789_v37, %v666_v43 }
 0x152   : > { %v668_v45 = vpop.f32.mrf.mxu0 }
 0x153   : > { %830 = vst.msk [vmem:[%s1434_s30 + $0x108] sm:$0xff] %vm797_vm1, %v790_v44  ;;  %v792_v46 = vadd.f32 %v791_v42, %v668_v45 }
 0x154   : > { %v670_v48 = vpop.f32.mrf.mxu0 }
 0x155   : > { %831 = vst [vmem:[%s1434_s30 + $0x110] sm:$0xff] %v792_v46  ;;  %v794_v49 = vadd.f32 %v793_v47, %v670_v48 }
 0x157   : > { %832 = vst.msk [vmem:[%s1434_s30 + $0x118] sm:$0xff] %vm797_vm1, %v794_v49 }
 0x158 PF: > { %s12_s9 = sadd.s32 1, %s1017_s9  }
 0x159   : > { %p9_p4 = scmp.ge.s32.totalorder %s12_s9, 5  }
 0x15b   :  { %11 = sbr.rel (!%p9_p4) target bundleno = 1 (0x1), region = 58 }

</bundles_post_ra>
